<compile_context>
chip_gen: v5e
topology: v5e:2x2
jax: 0.10.0
libtpu: 0.0.40
codegen_flags: <defaults>
</compile_context>

<pallas_src>
import numpy as np
import jax
import jax.numpy as jnp
from jax.experimental import pallas as pl
from jax.experimental.pallas import tpu as pltpu


# ---------------------------------------------------------------------------
# Kernels
# ---------------------------------------------------------------------------

def _pe_fused_kernel(x_ref, m_ref, p_ref, o_ref):
    """One grid step = one batch element's full (S, D) slab, read once.

    x_ref : (1, S, D) float32   input slab
    m_ref : (1, S, 1) float32   per-position mask (0.0 / 1.0), lane-broadcast
    p_ref : (1, S, D) p_dtype   sinusoid table slice (shared across batch)
    o_ref : (1, S, D) float32   output
    """
    x = x_ref[...]
    # Per-batch global min / max fused into the same pass (no 2nd HBM read of X).
    mn = jnp.min(x)
    mx = jnp.max(x)
    # Reciprocal-multiply instead of a per-element divide (~1 ulp vs reference).
    inv = jnp.float32(1.0) / (mx + jnp.float32(1e-7) - mn)
    xn = (x - mn) * inv
    xm = xn * m_ref[...]                                     # (1,S,1) * (1,S,D)
    o_ref[...] = (
        jnp.where(xm == jnp.float32(0.0), jnp.float32(1e-9), xm)
        + p_ref[...].astype(jnp.float32)
    )


def _pe_tiled_kernel(mn_ref, inv_ref, x_ref, m_ref, p_ref, o_ref):
    """Two-pass fallback: stats precomputed in the wrapper (1-D SMEM arrays)."""
    b = pl.program_id(1)
    mn = mn_ref[b]
    inv = inv_ref[b]
    xn = (x_ref[...] - mn) * inv
    xm = xn * m_ref[...]
    o_ref[...] = (
        jnp.where(xm == jnp.float32(0.0), jnp.float32(1e-9), xm)
        + p_ref[...].astype(jnp.float32)
    )


# ---------------------------------------------------------------------------
# Positional table (matches the PyTorch __init__)
# ---------------------------------------------------------------------------

def make_positional_table(len_feature_input: int, max_len: int = 1000) -> jnp.ndarray:
    D = len_feature_input
    pos = np.arange(0, max_len, dtype=np.float32).reshape(-1, 1)
    div = np.power(10000.0, np.arange(0, D, 2, dtype=np.float32) / D)
    Xp = pos / div  # (max_len, ceil(D/2))
    P = np.zeros((1, max_len, D), dtype=np.float32)
    P[:, :, 0::2] = np.sin(Xp)
    if D % 2 == 0:
        P[:, :, 1::2] = np.cos(Xp)
    else:
        P[:, :, 1::2] = np.cos(Xp[:, :-1])
    return jnp.asarray(P)


# ---------------------------------------------------------------------------
# Wrapper
# ---------------------------------------------------------------------------

def positional_encoding_forward(X: jnp.ndarray, mask: jnp.ndarray, P: jnp.ndarray,
                                *,
                                p_dtype=jnp.float32,
                                fused_vmem_budget_bytes: int = 24 * 1024 * 1024,
                                two_pass_tile_budget_bytes: int = 12 * 1024 * 1024,
                                force_two_pass: bool = False,
                                max_seq_tile: int | None = None) -> jnp.ndarray:
    """X: (B, S, D) float32, mask: (B, S) bool, P: (1, max_len, D) float32."""
    B, S, D = X.shape
    assert P.ndim == 3 and P.shape[0] == 1 and P.shape[2] == D
    assert S <= P.shape[1], "sequence length exceeds positional table max_len"

    X = X.astype(jnp.float32)
    m3 = mask.astype(jnp.float32)[:, :, None]        # (B, S, 1): tiny; no (B,S,D) HBM broadcast
    Ps = P[:, :S, :].astype(p_dtype)                 # (1, S, D): small, shared across batch

    lanes = ((D + 127) // 128) * 128                 # VMEM lane padding of a (., D) tile
    p_bytes = jnp.dtype(p_dtype).itemsize

    # VMEM for one fused grid step: X + out (f32) + P + mask, lane-padded.
    slab_bytes = S * lanes * (4 + 4 + p_bytes) + S * 128 * 4
    use_fused = (not force_two_pass) and (2 * slab_bytes <= fused_vmem_budget_bytes)

    if use_fused:
        vmem_limit = 32 * 1024 * 1024 if 2 * slab_bytes > 12 * 1024 * 1024 else None
        grid_spec = pltpu.PrefetchScalarGridSpec(
            num_scalar_prefetch=0,
            grid=(B,),                                                   # B>=2 -> both v7x TCs
            in_specs=[
                pl.BlockSpec((1, S, D), lambda b: (b, 0, 0)),            # X
                pl.BlockSpec((1, S, 1), lambda b: (b, 0, 0)),            # mask (f32, compact)
                pl.BlockSpec((1, S, D), lambda b: (0, 0, 0)),            # P (constant block -> 1 DMA)
            ],
            out_specs=pl.BlockSpec((1, S, D), lambda b: (b, 0, 0)),
        )
        return pl.pallas_call(
            _pe_fused_kernel,
            out_shape=jax.ShapeDtypeStruct((B, S, D), jnp.float32),
            grid_spec=grid_spec,
            compiler_params=pltpu.CompilerParams(
                dimension_semantics=("parallel",),
                vmem_limit_bytes=vmem_limit),
        )(X, m3, Ps)

    # ---- Two-pass fallback (huge S per batch, or B==1 on v7x wanting row tiles) ----
    Xf = X.reshape(B, S * D)
    mn = jnp.min(Xf, axis=-1)
    mx = jnp.max(Xf, axis=-1)
    inv = jnp.float32(1.0) / (mx + jnp.float32(1e-7) - mn)

    bytes_per_row = lanes * (4 + 4 + p_bytes) + 128 * 4
    ts = two_pass_tile_budget_bytes // (2 * bytes_per_row)
    if max_seq_tile is not None:
        ts = min(ts, max_seq_tile)
    ts = int(max(1, min(ts, S)))
    if S >= 8:
        ts = max(8, (ts // 8) * 8)                   # multiple of 8 (sublane rule)
    else:
        ts = S                                       # block dim == full dim is always legal
    n_tiles = pl.cdiv(S, ts)
    vmem_limit = 32 * 1024 * 1024 if 2 * ts * bytes_per_row > 12 * 1024 * 1024 else None

    grid_spec = pltpu.PrefetchScalarGridSpec(
        num_scalar_prefetch=0,
        grid=(n_tiles, B),                           # batch innermost: shared P tile not re-fetched
        in_specs=[
            pl.BlockSpec(memory_space=pltpu.MemorySpace.SMEM),           # mn (B,) f32
            pl.BlockSpec(memory_space=pltpu.MemorySpace.SMEM),           # inv (B,) f32
            pl.BlockSpec((1, ts, D), lambda j, b: (b, j, 0)),            # X
            pl.BlockSpec((1, ts, 1), lambda j, b: (b, j, 0)),            # mask
            pl.BlockSpec((1, ts, D), lambda j, b: (0, j, 0)),            # P (shared)
        ],
        out_specs=pl.BlockSpec((1, ts, D), lambda j, b: (b, j, 0)),
    )
    return pl.pallas_call(
        _pe_tiled_kernel,
        out_shape=jax.ShapeDtypeStruct((B, S, D), jnp.float32),
        grid_spec=grid_spec,
        compiler_params=pltpu.CompilerParams(
            dimension_semantics=("parallel", "parallel"),
            vmem_limit_bytes=vmem_limit),
    )(mn, inv, X, m3, Ps)


# ---------------------------------------------------------------------------
# Reference + self-test
# ---------------------------------------------------------------------------

def _reference(X, mask, P):
    B, S, D = X.shape
    Xf = X.reshape(B, -1)
    mx = jnp.max(Xf, axis=-1, keepdims=True)
    mn = jnp.min(Xf, axis=-1, keepdims=True)
    Xf = (Xf - mn) / (mx + 1e-07 - mn)
    Xn = Xf.reshape(X.shape)
    Xn = Xn * mask.astype(jnp.float32)[..., None]
    Xn = jnp.where(Xn == 0.0, 1e-09, Xn)
    return Xn + P[:, :S, :]


if __name__ == "__main__":
    key = jax.random.PRNGKey(0)

    def run_case(B, S, D, max_len, **kw):
        kx, km = jax.random.split(jax.random.fold_in(key, S * 1000 + D))
        X = jax.random.normal(kx, (B, S, D), dtype=jnp.float32)
        mask = jax.random.bernoulli(km, p=0.75, shape=(B, S))
        P = make_positional_table(D, max_len=max_len)
        out = jax.block_until_ready(positional_encoding_forward(X, mask, P, **kw))
        ref = _reference(X, mask, P)
        assert out.shape == (B, S, D)
        assert jnp.allclose(out, ref, atol=1e-5, rtol=1e-5), (B, S, D, kw)

    # Module-typical shapes: fused single-pass path (grid=(B,)).
    run_case(B=2, S=8, D=32, max_len=64)
    # Ragged S*D (not a multiple of 128): no padding / post-slice needed.
    run_case(B=2, S=12, D=24, max_len=32)
    # Long-sequence style two-pass fallback with sequence tiling (grid=(2, 2)).
    run_case(B=2, S=16, D=32, max_len=64, force_two_pass=True, max_seq_tile=8)

    print("KERNEL_OK")
</pallas_src>

<mosaic_0001>
module attributes {stable_mosaic.version = 11 : i64} {
  func.func @_pe_fused_kernel(%arg0: i32, %arg1: memref<1x8x32xf32, #tpu.memory_space<vmem>>, %arg2: memref<1x8x1xf32, #tpu.memory_space<vmem>>, %arg3: memref<1x8x32xf32, #tpu.memory_space<vmem>>, %arg4: memref<1x8x32xf32, #tpu.memory_space<vmem>>) attributes {dimension_semantics = [#tpu.dimension_semantics<parallel>], iteration_bounds = array<i64: 2>, scalar_prefetch = 0 : i64, scratch_operands = 0 : i64, tpu.core_type = #tpu.core_type<tc>, window_params = [{transform_indices = @transform_0, window_bounds = array<i64: 1, 8, 32>}, {transform_indices = @transform_1, window_bounds = array<i64: 1, 8, 1>}, {pipeline_mode = #tpu.pipeline_mode<synchronous>, transform_indices = @transform_2, window_bounds = array<i64: 1, 8, 32>}, {transform_indices = @transform_3, window_bounds = array<i64: 1, 8, 32>}]} {
    %c0 = arith.constant 0 : index
    %c0_0 = arith.constant 0 : index
    %c0_1 = arith.constant 0 : index
    %0 = vector.load %arg1[%c0, %c0_0, %c0_1] : memref<1x8x32xf32, #tpu.memory_space<vmem>>, vector<1x8x32xf32>
    %1 = vector.shape_cast %0 : vector<1x8x32xf32> to vector<1x1x8x32xf32>
    %cst = arith.constant dense<0x7F800000> : vector<1xf32>
    %2 = vector.multi_reduction <minimumf>, %1, %cst [1, 2, 3] : vector<1x1x8x32xf32> to vector<1xf32>
    %3 = vector.shape_cast %2 : vector<1xf32> to vector<1x1x1x1xf32>
    %4 = vector.extract %3[0, 0, 0, 0] : f32 from vector<1x1x1x1xf32>
    %5 = vector.shape_cast %0 : vector<1x8x32xf32> to vector<1x1x8x32xf32>
    %cst_2 = arith.constant dense<0xFF800000> : vector<1xf32>
    %6 = vector.multi_reduction <maximumf>, %5, %cst_2 [1, 2, 3] : vector<1x1x8x32xf32> to vector<1xf32>
    %7 = vector.shape_cast %6 : vector<1xf32> to vector<1x1x1x1xf32>
    %8 = vector.extract %7[0, 0, 0, 0] : f32 from vector<1x1x1x1xf32>
    %cst_3 = arith.constant 1.000000e-07 : f32
    %9 = arith.addf %8, %cst_3 : f32
    %10 = arith.subf %9, %4 : f32
    %cst_4 = arith.constant 1.000000e+00 : f32
    %11 = arith.divf %cst_4, %10 : f32
    %12 = vector.broadcast %4 : f32 to vector<1x8x32xf32>
    %13 = arith.subf %0, %12 : vector<1x8x32xf32>
    %14 = vector.broadcast %11 : f32 to vector<1x8x32xf32>
    %15 = arith.mulf %13, %14 : vector<1x8x32xf32>
    %c0_5 = arith.constant 0 : index
    %c0_6 = arith.constant 0 : index
    %c0_7 = arith.constant 0 : index
    %16 = vector.load %arg2[%c0_5, %c0_6, %c0_7] : memref<1x8x1xf32, #tpu.memory_space<vmem>>, vector<1x8x1xf32>
    %17 = vector.broadcast %16 : vector<1x8x1xf32> to vector<1x8x32xf32>
    %18 = arith.mulf %15, %17 : vector<1x8x32xf32>
    %cst_8 = arith.constant 0.000000e+00 : f32
    %19 = vector.broadcast %cst_8 : f32 to vector<1x8x32xf32>
    %20 = arith.cmpf oeq, %18, %19 : vector<1x8x32xf32>
    %cst_9 = arith.constant 9.99999971E-10 : f32
    %21 = vector.broadcast %cst_9 : f32 to vector<1x8x32xf32>
    %22 = arith.select %20, %21, %18 : vector<1x8x32xi1>, vector<1x8x32xf32>
    %c0_10 = arith.constant 0 : index
    %c0_11 = arith.constant 0 : index
    %c0_12 = arith.constant 0 : index
    %23 = vector.load %arg3[%c0_10, %c0_11, %c0_12] : memref<1x8x32xf32, #tpu.memory_space<vmem>>, vector<1x8x32xf32>
    %24 = arith.addf %22, %23 : vector<1x8x32xf32>
    %c0_13 = arith.constant 0 : index
    %c0_14 = arith.constant 0 : index
    %c0_15 = arith.constant 0 : index
    %25 = vector.load %arg4[%c0_13, %c0_14, %c0_15] : memref<1x8x32xf32, #tpu.memory_space<vmem>>, vector<1x8x32xf32>
    tpu.vector_store %arg4[%c0_13, %c0_14, %c0_15], %24 {strides = array<i32>} : memref<1x8x32xf32, #tpu.memory_space<vmem>>, vector<1x8x32xf32>,
    return
  }
  func.func @transform_0(%arg0: i32) -> (i32, i32, i32) {
    %c0_i32 = arith.constant 0 : i32
    %c0_i32_0 = arith.constant 0 : i32
    %c0_i32_1 = arith.constant 0 : i32
    return %arg0, %c0_i32, %c0_i32_0 : i32, i32, i32
  }
  func.func @transform_1(%arg0: i32) -> (i32, i32, i32) {
    %c0_i32 = arith.constant 0 : i32
    %c0_i32_0 = arith.constant 0 : i32
    %c0_i32_1 = arith.constant 0 : i32
    return %arg0, %c0_i32, %c0_i32_0 : i32, i32, i32
  }
  func.func @transform_2(%arg0: i32) -> (i32, i32, i32) {
    %c0_i32 = arith.constant 0 : i32
    %c0_i32_0 = arith.constant 0 : i32
    %c0_i32_1 = arith.constant 0 : i32
    %c0_i32_2 = arith.constant 0 : i32
    return %c0_i32, %c0_i32_0, %c0_i32_1 : i32, i32, i32
  }
  func.func @transform_3(%arg0: i32) -> (i32, i32, i32) {
    %c0_i32 = arith.constant 0 : i32
    %c0_i32_0 = arith.constant 0 : i32
    %c0_i32_1 = arith.constant 0 : i32
    return %arg0, %c0_i32, %c0_i32_0 : i32, i32, i32
  }
}

</mosaic_0001>

<bundles_post_ra>
// kernel: tpu_custom_call.1
= control target key start
LH: loop header
LB: loop body
LE: loop exit
PB: predicated region body
PF: predicated region fallthrough
CT: control target
= control target key end

     0   :  { %8 = vsyncpa [#allocation3], 0  ;;  %s642_s0 = inlined_call_operand.vmem [shape: f32[2,8,32], index: 0, kind: input, shape index: {}]   ;;  %s643_s1 = inlined_call_operand.vmem [shape: f32[2,8,1], index: 1, kind: input, shape index: {}]   ;;  %s644_s2 = inlined_call_operand.hbm [shape: f32[1,8,32], index: 2, kind: input, shape index: {}]   ;;  %s645_s3 = inlined_call_operand.hbm [shape: f32[2,8,32], index: 3, kind: output, shape index: {}]  }
   0x1   :  { %9 = vsyncpa [#allocation4], 0 }
   0x2   :  { %11 = vsyncpa [#allocation4 + $0x1], 0  ;;  %s547_s12 = smov 0   ;;  %s549_s13 = smov 0  }
   0x3   :  { %s551_s14 = smov 0   ;;  %s553_s15 = smov 0  }
   0x4 LB: > { %s568_s16 = sadd.s32 4294967295, %s523_s15   ;;  %s353_s17 = sadd.s32 4294967294, %s523_s15   ;;  %s523_s15 = sphi %s553_s15, %s651_s15   ;;  %s519_s14 = sphi %s551_s14, %s650_s14   ;;  %s515_s13 = sphi %s549_s13, %s649_s13   ;;  %s511_s12 = sphi %s547_s12, %s648_s12  }
   0x5   : > { %s572_s18 = sadd.s32 1, %s523_s15   ;;  %s97_s19 = sadd.s32 1, %s519_s14 }
   0x6   : > { %s94_s20 = ssub.s32 %s523_s15, %s572_s18  ;;  %p107_p0 = scmp.ne.s32.totalorder %s519_s14, %s515_s13 }
   0x7   : > { %p95_p1 = scmp.eq.s32.totalorder %s94_s20, 0  ;;  %p108_p2 = scmp.eq.s32.totalorder %s568_s16, 1 }
   0x8   : > { %p113_p3 = scmp.ne.s32.totalorder %s515_s13, %s511_s12  ;;  %p114_p4 = scmp.eq.s32.totalorder %s353_s17, 1 }
   0x9   : > { %s583_s21 = scalar_select %p95_p1, %s519_s14, %s97_s19  }
   0xa   : > { %p585_p5 = por %p108_p2, %p107_p0  ;;  %p589_p6 = por %p114_p4, %p113_p3 }
   0xb   : > { %p354_p7 = scmp.ge.s32.totalorder %s523_s15, 1  ;;  %p121_p8 = scmp.lt.s32.totalorder %s523_s15, 3 }
   0xc   : > { %p386_p9 = scmp.eq.s32.totalorder %s568_s16, 0  ;;  %s133_s26 = sshll.u32 %s644_s2, 4  ;;  %s134_s26 = int_to_ptr.hbm [resolvable:$true] %s133_s26 }
   0xd   : > { %p122_p10 = pnand %p354_p7, %p121_p8  ;;  %s525_s27 = smov [#allocation2]  }
   0xe   : > { %s135_s28 = sshll.u32 %s525_s27, 4  ;;  %s136_s28 = int_to_ptr.vmem [resolvable:$true] %s135_s28 }
   0xf   : > { %p378_p11 = pneg %p122_p10  ;;  %162 = sbr.rel (%p122_p10) target bundleno = 299 (0x12b), region = 32 }
  0x11   : > { %p379_p12 = pnand %p386_p9, %p378_p11 }
  0x13   : > { %381 = dma.hbm_to_vmem [thread:$0]  (!%p379_p12), %s134_s26, 128, %s136_s28, [#allocation3]  }
  0x14   : > { %502 = dma.done.wait (%p386_p9), [#allocation3], 128  }
  0x15   : > { %504 = vsyncadd (%p386_p9), [#allocation3], 4294967168  ;;  %p190_p13 = scmp.lt.s32.totalorder %s568_s16, 1  ;;  %vm199_vm0 = vcmask 261120   ;;  %v526_v4 = vmov 0   ;;  %s187_s20 = sand.u32 1, %s515_s13  }
  0x16   : > { %423 = vset.pattern.permute.xlu1 %v526_v4  ;;  %424 = vset.pattern.permute.xlu0 %v526_v4  ;;  %s359_s24 = sshll.u32 %s187_s20, 3  ;;  %s363_s25 = sshll.u32 %s568_s16, 3  ;;  %v251_v36 = vld [vmem:[#allocation2] sm:$0xff] }
  0x17   : > { %s191_s29 = scalar_select %p190_p13, %s568_s16, 1 }
  0x18   : > { %s255_s16 = scalar_lea.sflag [#allocation4], %s187_s20 }
  0x19   : > { %s360_s30 = sshll.u32 %s191_s29, 3  ;;  %s265_s29 = scalar_lea.hbm %s645_s3, %s363_s25 }
  0x1a   : > { %s193_s6 = scalar_lea.vmem %s642_s0, %s360_s30  ;;  %s197_s9 = scalar_lea.vmem %s643_s1, %s360_s30 }
  0x1b   : > { %v198_v0 = vld [vmem:[%s193_s6] sm:$0xff]  ;;  %s189_s30 = scalar_lea.vmem [#allocation5], %s359_s24  ;;  %s269_s5 = sshll.u32 %s265_s29, 4  ;;  %s270_s5 = int_to_ptr.hbm [resolvable:$true] %s269_s5 }
  0x1c   : > { %v200_v1 = vsel %vm199_vm0, %v198_v0, inf  ;;  %v210_v2 = vsel %vm199_vm0, %v198_v0, -inf  ;;  %v242_v3 = vld [vmem:[%s197_s9] sm:$0xff]  ;;  %s267_s4 = sshll.u32 %s189_s30, 4  ;;  %s471_s6 = sshra.s32 %s270_s5, 4  ;;  %s268_s4 = int_to_ptr.vmem [resolvable:$true] %s267_s4  ;;  %s472_s6 = int_to_ptr.hbm [resolvable:$true] %s471_s6 }
  0x1d   : > { %201 = vmin.xlane.f32.xlu0 %v200_v1  ;;  %245 = vperm.xlu1 %423, %v242_v3   ;;  %s473_s7 = scalar_lea.hbm %s472_s6, 8  ;;  %p478_p3 = scmp.lt.s32.totalorder %s472_s6, %s645_s3 }
  0x1e   : > { %p474_p0 = scmp.ne.s32.totalorder %s472_s6, %s473_s7 }
  0x20   : > { %p475_p1 = pnand %p474_p0, %p585_p5 }
  0x22   : > { %p476_p2 = pneg %p475_p1 }
  0x25   : > { %211 = vmax.xlane.f32.xlu0 %v210_v2 }
  0x8f   : > { %v246_v33 = vpop.permute.xlu1 %245 }
  0x90   : > { %v202_v5 = vpop.xlane.xlu0 %201 }
  0x91   : > { %v203_v6 = vrot.slane %v202_v5, 4 }
  0x93   : > { %v204_v7 = vmin.f32 %v202_v5, %v203_v6 }
  0x95   : > { %v205_v8 = vrot.slane %v204_v7, 2 }
  0x97   : > { %v206_v9 = vmin.f32 %v204_v7, %v205_v8 }
  0x98   : > { %v212_v10 = vpop.xlane.xlu0 %211 }
  0x99   : > { %v213_v11 = vrot.slane %v212_v10, 4  ;;  %v207_v12 = vrot.slane %v206_v9, 1 }
  0x9b   : > { %v214_v13 = vmax.f32 %v212_v10, %v213_v11  ;;  %v208_v14 = vmin.f32 %v206_v9, %v207_v12 }
  0x9d   : > { %v215_v15 = vrot.slane %v214_v13, 2  ;;  %366 = vpush %v208_v14 }
  0x9f   : > { %v216_v16 = vmax.f32 %v214_v13, %v215_v15 }
  0xa1   : > { %v217_v17 = vrot.slane %v216_v16, 1 }
  0xa3   : > { %v218_v18 = vmax.f32 %v216_v16, %v217_v17 }
  0xa5   : > { %368 = vpush %v218_v18 }
  0xce   : > { %s367_s10 = spop %366 }
  0xcf   : > { %v238_v30 = vstv %s367_s10 }
  0xd0   : > { %v239_v31 = vsub.f32 %v198_v0, %v238_v30 }
  0xd6   : > { %s369_s11 = spop %368 }
  0xd7   : > { %s220_s17 = sadd.f32 1e-07, %s369_s11 }
  0xd9   : > { %s221_s19 = ssub.f32 %s220_s17, %s367_s10  ;;  %s477_s10 = scalar_lea.hbm %s645_s3, 16 }
  0xda   : > { %p479_p4 = scmp.lt.s32.totalorder %s477_s10, %s473_s7 }
  0xdb   : > { %v222_v19 = vstv %s221_s19 }
  0xdc   : > { %425 = vrcp.f32 %v222_v19  ;;  %v234_v23 = vand.u32 2147483648, %v222_v19  ;;  %v232_v25 = vand.u32 2147483647, %v222_v19  ;;  %vm228_vm2 = vweird.f32 %v222_v19  ;;  %p480_p7 = por %p479_p4, %p478_p3 }
  0xde   : > { %v235_v27 = vor.u32 1.1754944e-38, %v234_v23  ;;  %vm233_vm4 = vcmp.eq.f32.partialorder %v232_v25, 8.507059e+37  ;;  %p481_p8 = pnand %p480_p7, %p476_p2 }
  0xe2   : > { %v426_v20 = vpop.eup %425 }
  0xe3   : > { %v224_v21 = vmul.f32 %v426_v20, %v222_v19  ;;  %vm229_vm1 = vweird.f32 %v426_v20 }
  0xe4   : > { %vm230_vm3 = vmor %vm228_vm2, %vm229_vm1 }
  0xe5   : > { %v225_v22 = vsub.f32 1.0, %v224_v21 }
  0xe7   : > { %v226_v24 = vmul.f32 %v426_v20, %v225_v22 }
  0xe9   : > { %v227_v26 = vadd.f32 %v426_v20, %v226_v24 }
  0xeb   : > { %v231_v28 = vsel %vm230_vm3, %v426_v20, %v227_v26 }
  0xec   : > { %v236_v29 = vsel %vm233_vm4, %v235_v27, %v231_v28 }
  0xed   : > { %370 = vpush %v236_v29 }
 0x11e   : > { %s371_s26 = spop %370 }
 0x11f   : > { %v240_v32 = vstv %s371_s26 }
 0x120   : > { %v241_v34 = vmul.f32 %v240_v32, %v239_v31 }
 0x122   : > { %v248_v35 = vmul.f32 %v246_v33, %v241_v34 }
 0x124   : > { %vm249_vm5 = vcmp.eq.f32.partialorder %v248_v35, 0.0 }
 0x125   : > { %v250_v37 = vsel %vm249_vm5, 1e-09, %v248_v35 }
 0x126   : > { %v252_v38 = vadd.f32 %v251_v36, %v250_v37 }
 0x128   : > { %253 = vst.msk [vmem:[%s189_s30] sm:$0xff] %vm199_vm0, %v252_v38 }
 0x129   : > { %484 = shalt.err (!%p481_p8)
}
 0x12a   : > { %376 = dma.vmem_to_hbm [thread:$0]  (%p585_p5), %s268_s4, 128, %s270_s5, %s255_s16  }
 0x12b PF: > { %p388_p9 = scmp.ge.s32.totalorder %s523_s15, 2  ;;  %s281_s19 = sand.u32 1, %s511_s12  }
 0x12c   : > { %s282_s20 = scalar_lea.sflag [#allocation4], %s281_s19 }
 0x12d   : > { %p383_p10 = pnand %p388_p9, %p589_p6 }
 0x12f   : > { %p384_p11 = pneg %p383_p10 }
 0x131   : > { %506 = dma.done.wait (%p384_p11), %s282_s20, 128  }
 0x132   : > { %508 = vsyncadd (%p384_p11), %s282_s20, 4294967168  ;;  %p14_p12 = scmp.ge.s32.totalorder %s572_s18, 4   ;;  %s648_s12 = smov %s515_s13 }
 0x133   : > { %s649_s13 = smov %s519_s14  ;;  %s650_s14 = smov %s583_s21 }
 0x134   : > { %s651_s15 = smov %s572_s18  ;;  %16 = sbr.rel (!%p14_p12) target bundleno = 4 (0x4), region = 75 }
 0x139   :  { %288 = vsyncpa [#allocation3], 1 }
 0x13a   :  { %290 = vsyncpa [#allocation3 + $0x1], 1 }
 0x13b   :  { %291 = vsyncpa [#allocation4], 1 }
 0x13c   :  { %293 = vsyncpa [#allocation4 + $0x1], 1 }

</bundles_post_ra>
